<compile_context>
chip_gen: v6e
topology: v6e:2x2x1
jax: 0.10.0
libtpu: 0.0.40
codegen_flags: <defaults>
</compile_context>

<pallas_src>
import functools

import jax
import jax.numpy as jnp
from jax.experimental import pallas as pl
from jax.experimental.pallas import tpu as pltpu


def _qkv_kernel(x_ref, w_ref, b_ref, out_ref):
    # x_ref: (tile_n, dim)      input row tile (native dtype, e.g. bf16/fp32)
    # w_ref: (dim, out_dim)     merged + pre-transposed weight (resident)
    # b_ref: (1, out_dim)       bias
    # out_ref: (tile_n, out_dim)
    acc = jnp.dot(x_ref[...], w_ref[...], preferred_element_type=jnp.float32)
    acc = acc + b_ref[...].astype(jnp.float32)   # (1, out_dim) broadcasts
    out_ref[...] = acc.astype(out_ref.dtype)


@functools.partial(jax.jit, static_argnames=("tile_n",))
def lora_qkv_forward(x, w_qkv, b_qkv, w_a_q, w_b_q, w_a_v, w_b_v, *,
                     tile_n=512):
    """x: [B, H, W, dim]. Returns [B, H, W, 3*dim] (LoRA on q and v slices)."""
    B, H, W, dim = x.shape
    out_dim = w_qkv.shape[0]            # 3*dim
    N = B * H * W

    # ---- Fold LoRA into the base projection (trace-time, plain JAX) -------
    # nn.Linear weights: W_qkv (out_dim, dim), A (r, dim), B (dim, r).
    # new_q = x @ A_q^T @ B_q^T  ==  x @ (B_q @ A_q)^T
    delta_q = jnp.dot(w_b_q, w_a_q, preferred_element_type=jnp.float32)
    delta_v = jnp.dot(w_b_v, w_a_v, preferred_element_type=jnp.float32)
    w_merged = w_qkv.astype(jnp.float32)
    w_merged = w_merged.at[:dim, :].add(delta_q)
    w_merged = w_merged.at[out_dim - dim:, :].add(delta_v)
    # Pre-transpose once so the kernel computes x @ W with no in-kernel .T
    w_t = w_merged.T.astype(w_qkv.dtype)              # (dim, out_dim)
    b2d = b_qkv.reshape(1, out_dim)

    # ---- Row tiling: clamp for small N, pad ragged tail ---------------------
    tn = max(8, min(tile_n, ((N + 7) // 8) * 8))
    tn = (tn // 8) * 8
    n_pad = pl.cdiv(N, tn) * tn

    x2d = x.reshape(N, dim)
    if n_pad != N:
        x2d = jnp.pad(x2d, ((0, n_pad - N), (0, 0)))

    grid = (n_pad // tn,)

    # ---- Explicit VMEM budget (double-buffered x/out tiles + resident W) ---
    xb = jnp.dtype(x.dtype).itemsize
    wb = jnp.dtype(w_t.dtype).itemsize
    need = (2 * tn * dim * xb            # x tile, double buffered
            + 2 * tn * out_dim * xb      # out tile, double buffered
            + dim * out_dim * wb         # resident merged weight
            + out_dim * 4)               # bias
    vmem_budget = int(min(max(2 * need, 8 << 20), 48 << 20))  # safe on v7x 64MiB

    out2d = pl.pallas_call(
        _qkv_kernel,
        out_shape=jax.ShapeDtypeStruct((n_pad, out_dim), x.dtype),
        grid_spec=pltpu.PrefetchScalarGridSpec(
            num_scalar_prefetch=0,
            grid=grid,
            in_specs=[
                pl.BlockSpec((tn, dim), lambda i: (i, 0)),        # x rows
                pl.BlockSpec((dim, out_dim), lambda i: (0, 0)),   # merged W^T
                pl.BlockSpec((1, out_dim), lambda i: (0, 0)),     # bias
            ],
            out_specs=pl.BlockSpec((tn, out_dim), lambda i: (i, 0)),
        ),
        compiler_params=pltpu.CompilerParams(
            dimension_semantics=("parallel",),
            vmem_limit_bytes=vmem_budget,
        ),
    )(x2d, w_t, b2d)

    if n_pad != N:
        out2d = out2d[:N]
    return out2d.reshape(B, H, W, out_dim)


def _reference(x, w_qkv, b_qkv, w_a_q, w_b_q, w_a_v, w_b_v):
    # Pure-JAX reference with the same semantics as the PyTorch module.
    dim = x.shape[-1]
    qkv = jnp.einsum("bhwc,oc->bhwo", x, w_qkv) + b_qkv
    new_q = jnp.einsum("bhwr,dr->bhwd",
                       jnp.einsum("bhwc,rc->bhwr", x, w_a_q), w_b_q)
    new_v = jnp.einsum("bhwr,dr->bhwd",
                       jnp.einsum("bhwc,rc->bhwr", x, w_a_v), w_b_v)
    qkv = qkv.at[..., :dim].add(new_q)
    qkv = qkv.at[..., -dim:].add(new_v)
    return qkv


if __name__ == "__main__":
    key = jax.random.PRNGKey(0)
    B, H, W, dim, r = 2, 8, 8, 32, 4
    out_dim = 3 * dim

    ks = jax.random.split(key, 7)
    x     = jax.random.normal(ks[0], (B, H, W, dim), dtype=jnp.float32)
    # qkv = nn.Linear(dim, 3*dim): weight (3*dim, dim), bias (3*dim,)
    w_qkv = jax.random.normal(ks[1], (out_dim, dim), dtype=jnp.float32) * 0.05
    b_qkv = jax.random.normal(ks[2], (out_dim,), dtype=jnp.float32) * 0.01
    # LoRA A: nn.Linear(dim, r, bias=False) -> weight (r, dim)
    # LoRA B: nn.Linear(r, dim, bias=False) -> weight (dim, r)
    w_a_q = jax.random.normal(ks[3], (r, dim), dtype=jnp.float32) * 0.05
    w_b_q = jax.random.normal(ks[4], (dim, r), dtype=jnp.float32) * 0.05
    w_a_v = jax.random.normal(ks[5], (r, dim), dtype=jnp.float32) * 0.05
    w_b_v = jax.random.normal(ks[6], (dim, r), dtype=jnp.float32) * 0.05

    out = lora_qkv_forward(x, w_qkv, b_qkv, w_a_q, w_b_q, w_a_v, w_b_v)
    out = jax.block_until_ready(out)

    ref = _reference(x, w_qkv, b_qkv, w_a_q, w_b_q, w_a_v, w_b_v)
    assert out.shape == (B, H, W, out_dim)
    assert jnp.allclose(out, ref, atol=1e-4, rtol=1e-4), "mismatch vs reference"

    print("KERNEL_OK")
</pallas_src>

<mosaic_0001>
module attributes {stable_mosaic.version = 11 : i64} {
  func.func @_qkv_kernel(%arg0: i32, %arg1: memref<128x32xf32, #tpu.memory_space<vmem>>, %arg2: memref<32x96xf32, #tpu.memory_space<vmem>>, %arg3: memref<1x96xf32, #tpu.memory_space<vmem>>, %arg4: memref<128x96xf32, #tpu.memory_space<vmem>>) attributes {dimension_semantics = [#tpu.dimension_semantics<parallel>], iteration_bounds = array<i64: 1>, scalar_prefetch = 0 : i64, scratch_operands = 0 : i64, tpu.core_type = #tpu.core_type<tc>, window_params = [{transform_indices = @transform_0, window_bounds = array<i64: 128, 32>}, {pipeline_mode = #tpu.pipeline_mode<synchronous>, transform_indices = @transform_1, window_bounds = array<i64: 32, 96>}, {pipeline_mode = #tpu.pipeline_mode<synchronous>, transform_indices = @transform_2, window_bounds = array<i64: 1, 96>}, {transform_indices = @transform_3, window_bounds = array<i64: 128, 96>}]} {
    %c0 = arith.constant 0 : index
    %c0_0 = arith.constant 0 : index
    %0 = vector.load %arg1[%c0, %c0_0] : memref<128x32xf32, #tpu.memory_space<vmem>>, vector<128x32xf32>
    %c0_1 = arith.constant 0 : index
    %c0_2 = arith.constant 0 : index
    %1 = vector.load %arg2[%c0_1, %c0_2] : memref<32x96xf32, #tpu.memory_space<vmem>>, vector<32x96xf32>
    %cst = arith.constant dense<0.000000e+00> : vector<128x96xf32>
    %2 = tpu.matmul %0, %1, %cst {dimension_numbers = #tpu.dot_dimension_numbers<[1], [0], [0], [1], [0, 0, 1, 1], [], []>} : vector<128x32xf32>, vector<32x96xf32>, vector<128x96xf32> -> vector<128x96xf32>
    %c0_3 = arith.constant 0 : index
    %c0_4 = arith.constant 0 : index
    %3 = vector.load %arg3[%c0_3, %c0_4] : memref<1x96xf32, #tpu.memory_space<vmem>>, vector<1x96xf32>
    %4 = vector.broadcast %3 : vector<1x96xf32> to vector<128x96xf32>
    %5 = arith.addf %2, %4 : vector<128x96xf32>
    %c0_5 = arith.constant 0 : index
    %c0_6 = arith.constant 0 : index
    %6 = vector.load %arg4[%c0_5, %c0_6] : memref<128x96xf32, #tpu.memory_space<vmem>>, vector<128x96xf32>
    tpu.vector_store %arg4[%c0_5, %c0_6], %5 {strides = array<i32>} : memref<128x96xf32, #tpu.memory_space<vmem>>, vector<128x96xf32>,
    return
  }
  func.func @transform_0(%arg0: i32) -> (i32, i32) {
    %c0_i32 = arith.constant 0 : i32
    %c0_i32_0 = arith.constant 0 : i32
    return %arg0, %c0_i32 : i32, i32
  }
  func.func @transform_1(%arg0: i32) -> (i32, i32) {
    %c0_i32 = arith.constant 0 : i32
    %c0_i32_0 = arith.constant 0 : i32
    %c0_i32_1 = arith.constant 0 : i32
    return %c0_i32, %c0_i32_0 : i32, i32
  }
  func.func @transform_2(%arg0: i32) -> (i32, i32) {
    %c0_i32 = arith.constant 0 : i32
    %c0_i32_0 = arith.constant 0 : i32
    %c0_i32_1 = arith.constant 0 : i32
    return %c0_i32, %c0_i32_0 : i32, i32
  }
  func.func @transform_3(%arg0: i32) -> (i32, i32) {
    %c0_i32 = arith.constant 0 : i32
    %c0_i32_0 = arith.constant 0 : i32
    return %arg0, %c0_i32 : i32, i32
  }
}

</mosaic_0001>

<bundles_post_ra>
// kernel: lora_qkv_forward.1
= control target key start
LH: loop header
LB: loop body
LE: loop exit
PB: predicated region body
PF: predicated region fallthrough
CT: control target
= control target key end

     0   :  { %vm42_vm0 = vcmask 261120   ;;  %s492_s0 = inlined_call_operand.vmem [shape: f32[128,32], index: 0, kind: input, shape index: {}]   ;;  %s493_s1 = inlined_call_operand.vmem [shape: f32[32,96], index: 1, kind: input, shape index: {}]   ;;  %s494_s2 = inlined_call_operand.vmem [shape: f32[1,96], index: 2, kind: input, shape index: {}]   ;;  %s495_s3 = inlined_call_operand.hbm [shape: f32[128,96], index: 3, kind: output, shape index: {}]  }
   0x1   :  { %v34_v0 = vld [vmem:[%s493_s1 + $0x18] sm:$0xff]  ;;  %v33_v1 = vld [vmem:[%s493_s1 + $0x10] sm:$0xff]  ;;  %v32_v2 = vld [vmem:[%s493_s1 + $0x8] sm:$0xff] }
   0x2   :  { %306 = vmatprep.subr.mxu0 %v34_v0  ;;  %338 = vmatprep.subr.mxu1 %v34_v0  ;;  %v31_v3 = vld [vmem:[%s493_s1] sm:$0xff] }
   0x3   :  { %307 = vmatpush3.msra.mxu0 %v34_v0  ;;  %342 = vmatpush3.msra.mxu1 %v34_v0  ;;  %v15_v4 = vld [vmem:[%s492_s0] sm:$0xff] }
   0x4   :  { %308 = vmatprep.subr.mxu0 %v33_v1  ;;  %339 = vmatprep.subr.mxu1 %v33_v1  ;;  %v23_v5 = vld [vmem:[%s492_s0 + $0x40] sm:$0xff] }
   0x5   :  { %309 = vmatpush3.msra.mxu0 %v33_v1  ;;  %343 = vmatpush3.msra.mxu1 %v33_v1 }
   0x6   :  { %310 = vmatprep.subr.mxu0 %v32_v2  ;;  %340 = vmatprep.subr.mxu1 %v32_v2 }
   0x7   :  { %311 = vmatpush3.msra.mxu0 %v32_v2  ;;  %344 = vmatpush3.msra.mxu1 %v32_v2 }
   0x8   :  { %8 = vsyncpa [#allocation3], 0  ;;  %312 = vmatprep.subr.mxu0 %v31_v3  ;;  %341 = vmatprep.subr.mxu1 %v31_v3  ;;  %v16_v6 = vld [vmem:[%s492_s0 + $0x8] sm:$0xff]  ;;  %v17_v8 = vld [vmem:[%s492_s0 + $0x10] sm:$0xff]  ;;  %vm236_vm1 = vcmask 785408  }
   0x9   :  { %v24_v7 = vld [vmem:[%s492_s0 + $0x48] sm:$0xff]  ;;  %313 = vmatpush3.msra.mxu0 %v31_v3  ;;  %345 = vmatpush3.msra.mxu1 %v31_v3  ;;  %v25_v9 = vld [vmem:[%s492_s0 + $0x50] sm:$0xff]  ;;  %v18_v10 = vld [vmem:[%s492_s0 + $0x18] sm:$0xff] }
   0xa   :  { %314 = vmatprep.mubr.msk.f32.mxu0 %vm42_vm0, %v15_v4  ;;  %326 = vmatprep.mubr.msk.f32.mxu1 %vm42_vm0, %v23_v5  ;;  %v26_v11 = vld [vmem:[%s492_s0 + $0x58] sm:$0xff]  ;;  %v19_v12 = vld [vmem:[%s492_s0 + $0x20] sm:$0xff]  ;;  %v20_v14 = vld [vmem:[%s492_s0 + $0x28] sm:$0xff] }
   0xb   :  { %315 = vmatmul.mubr.msk.f32.vlgmr.msra.gmra.mxu0 %vm42_vm0, %v16_v6  ;;  %327 = vmatmul.mubr.msk.f32.vlgmr.msra.gmra.mxu1 %vm42_vm0, %v24_v7  ;;  %v27_v13 = vld [vmem:[%s492_s0 + $0x60] sm:$0xff]  ;;  %v28_v15 = vld [vmem:[%s492_s0 + $0x68] sm:$0xff]  ;;  %v21_v16 = vld [vmem:[%s492_s0 + $0x30] sm:$0xff] }
   0xc   :  { %317 = vmatprep.mubr.msk.f32.mxu0 %vm42_vm0, %v17_v8  ;;  %329 = vmatprep.mubr.msk.f32.mxu1 %vm42_vm0, %v25_v9  ;;  %v29_v17 = vld [vmem:[%s492_s0 + $0x70] sm:$0xff]  ;;  %v22_v18 = vld [vmem:[%s492_s0 + $0x38] sm:$0xff]  ;;  %v269_v20 = vld [vmem:[%s494_s2] ss:$0 sm:$0xff] }
   0xd   :  { %v30_v19 = vld [vmem:[%s492_s0 + $0x78] sm:$0xff]  ;;  %s371_s0 = smov [#allocation2]  }
   0xe   :  { %s258_s2 = sshll.u32 %s371_s0, 4  ;;  %s259_s2 = int_to_ptr.vmem [resolvable:$true] %s258_s2 }
   0xf   :  { %318 = vmatmul.mubr.msk.f32.gmra.mxu0 %vm42_vm0, %v18_v10  ;;  %330 = vmatmul.mubr.msk.f32.gmra.mxu1 %vm42_vm0, %v26_v11  ;;  %s349_s1 = scalar_lea.vmem %s259_s2, 2048  ;;  %p354_p1 = scmp.lt.s32.totalorder %s259_s2, %s259_s2 }
  0x10   :  { %320 = vmatprep.mubr.msk.f32.mxu0 %vm42_vm0, %v19_v12  ;;  %332 = vmatprep.mubr.msk.f32.mxu1 %vm42_vm0, %v27_v13  ;;  %p350_p0 = scmp.ne.s32.totalorder %s259_s2, %s349_s1  ;;  %p355_p2 = scmp.lt.s32.totalorder %s349_s1, %s349_s1 }
  0x12   :  { %p356_p3 = por %p355_p2, %p354_p1 }
  0x13   :  { %321 = vmatmul.mubr.msk.f32.gmra.mxu0 %vm42_vm0, %v20_v14  ;;  %333 = vmatmul.mubr.msk.f32.gmra.mxu1 %vm42_vm0, %v28_v15 }
  0x14   :  { %323 = vmatprep.mubr.msk.f32.mxu0 %vm42_vm0, %v21_v16  ;;  %335 = vmatprep.mubr.msk.f32.mxu1 %vm42_vm0, %v29_v17  ;;  %p357_p4 = pnand %p356_p3, %p350_p0 }
  0x17   :  { %324 = vmatmul.mubr.msk.f32.gmra.mxu0 %vm42_vm0, %v22_v18  ;;  %336 = vmatmul.mubr.msk.f32.gmra.mxu1 %vm42_vm0, %v30_v19 }
  0xcb   :  { %v316_v21 = vpop.f32.mrf.mxu0  ;;  %v328_v22 = vpop.f32.mrf.mxu1 }
  0xcc   :  { %v163_v23 = vadd.f32 %v316_v21, %v269_v20  ;;  %v203_v24 = vadd.f32 %v328_v22, %v269_v20 }
  0xcd   :  { %v157_v25 = vpop.f32.mrf.mxu0  ;;  %v197_v26 = vpop.f32.mrf.mxu1 }
  0xce   :  { %238 = vst.msk [vmem:[#allocation2 + $0x8] sm:$0xff] %vm236_vm1, %v163_v23  ;;  %246 = vst.msk [vmem:[#allocation2 + $0x48] sm:$0xff] %vm236_vm1, %v203_v24  ;;  %v158_v27 = vadd.f32 %v269_v20, %v157_v25  ;;  %v198_v28 = vadd.f32 %v269_v20, %v197_v26 }
  0xcf   :  { %v319_v29 = vpop.f32.mrf.mxu0  ;;  %v331_v30 = vpop.f32.mrf.mxu1 }
  0xd0   :  { %237 = vst.msk [vmem:[#allocation2] sm:$0xff] %vm236_vm1, %v158_v27  ;;  %245 = vst.msk [vmem:[#allocation2 + $0x40] sm:$0xff] %vm236_vm1, %v198_v28  ;;  %v173_v31 = vadd.f32 %v319_v29, %v269_v20  ;;  %v213_v32 = vadd.f32 %v331_v30, %v269_v20 }
  0xd1   :  { %v167_v33 = vpop.f32.mrf.mxu0  ;;  %v207_v34 = vpop.f32.mrf.mxu1 }
  0xd2   :  { %240 = vst.msk [vmem:[#allocation2 + $0x18] sm:$0xff] %vm236_vm1, %v173_v31  ;;  %248 = vst.msk [vmem:[#allocation2 + $0x58] sm:$0xff] %vm236_vm1, %v213_v32  ;;  %v168_v35 = vadd.f32 %v269_v20, %v167_v33  ;;  %v208_v36 = vadd.f32 %v269_v20, %v207_v34 }
  0xd3   :  { %v322_v37 = vpop.f32.mrf.mxu0  ;;  %v334_v38 = vpop.f32.mrf.mxu1 }
  0xd4   :  { %239 = vst.msk [vmem:[#allocation2 + $0x10] sm:$0xff] %vm236_vm1, %v168_v35  ;;  %247 = vst.msk [vmem:[#allocation2 + $0x50] sm:$0xff] %vm236_vm1, %v208_v36  ;;  %v183_v39 = vadd.f32 %v322_v37, %v269_v20  ;;  %v223_v40 = vadd.f32 %v334_v38, %v269_v20 }
  0xd5   :  { %v177_v41 = vpop.f32.mrf.mxu0  ;;  %v217_v42 = vpop.f32.mrf.mxu1 }
  0xd6   :  { %242 = vst.msk [vmem:[#allocation2 + $0x28] sm:$0xff] %vm236_vm1, %v183_v39  ;;  %250 = vst.msk [vmem:[#allocation2 + $0x68] sm:$0xff] %vm236_vm1, %v223_v40  ;;  %v178_v43 = vadd.f32 %v269_v20, %v177_v41  ;;  %v218_v44 = vadd.f32 %v269_v20, %v217_v42 }
  0xd7   :  { %v325_v45 = vpop.f32.mrf.mxu0  ;;  %v337_v46 = vpop.f32.mrf.mxu1 }
  0xd8   :  { %241 = vst.msk [vmem:[#allocation2 + $0x20] sm:$0xff] %vm236_vm1, %v178_v43  ;;  %249 = vst.msk [vmem:[#allocation2 + $0x60] sm:$0xff] %vm236_vm1, %v218_v44  ;;  %v193_v47 = vadd.f32 %v325_v45, %v269_v20  ;;  %v233_v48 = vadd.f32 %v337_v46, %v269_v20 }
  0xd9   :  { %v187_v49 = vpop.f32.mrf.mxu0  ;;  %v227_v50 = vpop.f32.mrf.mxu1 }
  0xda   :  { %244 = vst.msk [vmem:[#allocation2 + $0x38] sm:$0xff] %vm236_vm1, %v193_v47  ;;  %252 = vst.msk [vmem:[#allocation2 + $0x78] sm:$0xff] %vm236_vm1, %v233_v48  ;;  %v188_v51 = vadd.f32 %v269_v20, %v187_v49  ;;  %v228_v52 = vadd.f32 %v269_v20, %v227_v50 }
  0xdc   :  { %243 = vst.msk [vmem:[#allocation2 + $0x30] sm:$0xff] %vm236_vm1, %v188_v51  ;;  %251 = vst.msk [vmem:[#allocation2 + $0x70] sm:$0xff] %vm236_vm1, %v228_v52 }
  0xdd   :  { %360 = shalt.err (!%p357_p4)
}
  0xde   :  { %s372_s26 = smov 128   ;;  %s373_s27 = smov 8  }
  0xdf   :  { %264 = dma.vmem_to_hbm [thread:$0]  %s259_s2, 2048, %s495_s3, [#allocation3], %s372_s26, %s372_s26, %s373_s27  }
  0xe0   :  { %369 = dma.done.wait [#allocation3], 2048  }
  0xe1   :  { %370 = vsyncadd [#allocation3], 4294965248 }
  0xe2   :  { %268 = vsyncpa [#allocation3], 1 }

</bundles_post_ra>
